<compile_context>
chip_gen: v6e
topology: v6e:2x2x1
jax: 0.10.0
libtpu: 0.0.40
codegen_flags: <defaults>
</compile_context>

<pallas_src>
import functools
import math

import jax
import jax.numpy as jnp
from jax.experimental import pallas as pl
from jax.experimental.pallas import tpu as pltpu

RESNETLAYERS = ['layer0', 'layer1', 'layer2', 'layer3', 'layer4', 'avgpool']
BN_EPS = 1e-5

TM_MAX = 512                          # M-tile cap (multiple of 8, fits VMEM everywhere)
VMEM_LIMIT = 48 * 1024 * 1024         # <= v7x physical VMEM with headroom


def _cdiv(a, b):
    return -(-a // b)


def _round_up(a, b):
    return _cdiv(a, b) * b


# ----------------------------------------------------------------------------
# Pallas kernels
# ----------------------------------------------------------------------------
def _conv_s1_kernel(*refs, offsets, mg, relu, has_res):
    """Stride-1 conv on one image: sum of tap matmuls over a resident padded
    image block (no im2col), fused bias (+residual) (+ReLU)."""
    if has_res:
        x_ref, w_ref, b_ref, r_ref, o_ref = refs
    else:
        x_ref, w_ref, b_ref, o_ref = refs
        r_ref = None

    tn = o_ref.shape[2]
    acc = jnp.zeros((mg, tn), jnp.float32)
    for t, off in enumerate(offsets):                       # static tap loop
        lhs = x_ref[0, off:off + mg, :]                     # (mg, Cin) bf16
        acc = acc + jnp.dot(lhs, w_ref[t],                  # (Cin, tn) bf16
                            preferred_element_type=jnp.float32)
    acc = acc + b_ref[...]                                  # BN bias (scale folded in W)
    if has_res:
        acc = acc + r_ref[0].astype(jnp.float32)
    if relu:
        acc = jnp.maximum(acc, 0.0)
    o_ref[0] = acc.astype(o_ref.dtype)


def _conv_strided_kernel(x_ref, w_ref, b_ref, o_ref, acc_ref, *, relu, ntaps):
    """Strided conv: M-tiled matmul with the kernel-row tap index as the last
    (reduction) grid axis; f32 accumulator scratch + pl.when init/finalize."""
    t = pl.program_id(2)

    @pl.when(t == 0)
    def _init():
        acc_ref[...] = jnp.zeros_like(acc_ref)

    acc_ref[...] += jnp.dot(x_ref[0], w_ref[0],
                            preferred_element_type=jnp.float32)

    @pl.when(t == ntaps - 1)
    def _finalize():
        r = acc_ref[...] + b_ref[...]
        if relu:
            r = jnp.maximum(r, 0.0)
        o_ref[...] = r.astype(o_ref.dtype)


def _maxpool_kernel(x_ref, o_ref):
    """Running max over the tap reduction axis (output block is resident)."""
    t = pl.program_id(1)

    @pl.when(t == 0)
    def _first():
        o_ref[...] = x_ref[0]

    @pl.when(t > 0)
    def _rest():
        o_ref[...] = jnp.maximum(o_ref[...], x_ref[0])


def _avgpool_kernel(x_ref, o_ref):
    o_ref[...] = jnp.mean(x_ref[0].astype(jnp.float32), axis=0, keepdims=True)


# ----------------------------------------------------------------------------
# Conv / pooling wrappers (glue: padding / reshapes; hot path in Pallas)
# ----------------------------------------------------------------------------
def _prep_weights(w_oihw, scale, kh, kw, cin, cout):
    """OIHW -> (kh*kw or kh, K, Cout) with BN scale folded in, bf16."""
    wt = jnp.transpose(w_oihw, (2, 3, 1, 0))                # (kh, kw, Cin, Cout)
    wt = wt * scale[None, None, None, :]
    return wt.astype(jnp.bfloat16)


def conv3x3_s1(x, w_oihw, scale, bias, *, relu, residual=None):
    """3x3 / stride-1 / pad-1 conv + folded BN + (residual) + (ReLU).

    Per-image "garbage-column" layout: the padded image is flattened to
    (Hp*Wp, Cin) and each tap is a contiguous row-range slice, so no im2col
    duplication is written to HBM.  Garbage columns are cropped in the wrapper.
    """
    n, h, w, cin = x.shape
    cout = w_oihw.shape[0]
    kh = kw = 3
    hp, wp = h + 2, w + 2
    ho, wo = h, w
    mg = ho * wp                                            # garbage-layout rows

    x_flat = jnp.pad(x, ((0, 0), (1, 1), (1, 1), (0, 0)))
    x_flat = x_flat.reshape(n, hp * wp, cin)
    x_flat = jnp.pad(x_flat, ((0, 0), (0, kw - 1), (0, 0))).astype(jnp.bfloat16)
    lp = x_flat.shape[1]

    wt = _prep_weights(w_oihw, scale, kh, kw, cin, cout).reshape(kh * kw, cin, cout)
    b2 = bias.reshape(1, cout).astype(jnp.float32)
    offsets = tuple(i * wp + j for i in range(kh) for j in range(kw))

    tn = cout if cout <= 256 else 256
    jt = cout // tn
    grid = (jt, n)                                          # weights outer, batch inner

    in_specs = [
        pl.BlockSpec((1, lp, cin), lambda j, b: (b, 0, 0)),
        pl.BlockSpec((kh * kw, cin, tn), lambda j, b: (0, 0, j)),
        pl.BlockSpec((1, tn), lambda j, b: (0, j)),
    ]
    args = [x_flat, wt, b2]
    has_res = residual is not None
    if has_res:
        res_g = jnp.pad(residual, ((0, 0), (0, 0), (0, wp - wo), (0, 0)))
        res_g = res_g.reshape(n, mg, cout).astype(jnp.bfloat16)
        in_specs.append(pl.BlockSpec((1, mg, tn), lambda j, b: (b, 0, j)))
        args.append(res_g)

    out = pl.pallas_call(
        functools.partial(_conv_s1_kernel, offsets=offsets, mg=mg,
                          relu=relu, has_res=has_res),
        out_shape=jax.ShapeDtypeStruct((n, mg, cout), jnp.bfloat16),
        grid=grid,
        in_specs=in_specs,
        out_specs=pl.BlockSpec((1, mg, tn), lambda j, b: (b, 0, j)),
        compiler_params=pltpu.CompilerParams(
            dimension_semantics=("parallel", "parallel"),
            vmem_limit_bytes=VMEM_LIMIT),
    )(*args)

    out = out.reshape(n, ho, wp, cout)[:, :, :wo, :]        # crop garbage columns
    return out


def conv_strided(x, w_oihw, scale, bias, *, stride, padding, relu):
    """Strided conv (conv1 7x7/s2, 3x3/s2, 1x1 downsample) + folded BN + (ReLU).

    Kernel-row tap decomposition: the row-tap tensor is only kh/s^2 x the input
    (vs kh*kw x for full im2col); the row index is a reduction grid axis.
    """
    cout, cin, kh, kw = w_oihw.shape
    n = x.shape[0]
    xp = jnp.pad(x, ((0, 0), (padding, padding), (padding, padding), (0, 0)))
    _, hp, wp, _ = xp.shape
    ho = (hp - kh) // stride + 1
    wo = (wp - kw) // stride + 1
    m = n * ho * wo
    kpr = kw * cin                                          # K per kernel row

    rows = []
    for i in range(kh):
        cols = [xp[:, i:i + stride * ho:stride, j:j + stride * wo:stride, :]
                for j in range(kw)]
        rows.append(jnp.concatenate(cols, axis=-1).reshape(m, kpr))
    xt = jnp.stack(rows, axis=0).astype(jnp.bfloat16)       # (kh, M, kw*Cin)

    wt = _prep_weights(w_oihw, scale, kh, kw, cin, cout).reshape(kh, kpr, cout)
    b2 = bias.reshape(1, cout).astype(jnp.float32)

    ntiles = _cdiv(m, TM_MAX)
    tm = _round_up(_cdiv(m, ntiles), 8)
    mpad = tm * ntiles
    if mpad != m:
        xt = jnp.pad(xt, ((0, 0), (0, mpad - m), (0, 0)))

    tn = cout if cout <= 256 else 256
    grid = (mpad // tm, cout // tn, kh)                     # reduction axis last

    out = pl.pallas_call(
        functools.partial(_conv_strided_kernel, relu=relu, ntaps=kh),
        out_shape=jax.ShapeDtypeStruct((mpad, cout), jnp.bfloat16),
        grid=grid,
        in_specs=[
            pl.BlockSpec((1, tm, kpr), lambda i, j, t: (t, i, 0)),
            pl.BlockSpec((1, kpr, tn), lambda i, j, t: (t, 0, j)),
            pl.BlockSpec((1, tn), lambda i, j, t: (0, j)),
        ],
        out_specs=pl.BlockSpec((tm, tn), lambda i, j, t: (i, j)),
        scratch_shapes=[pltpu.VMEM((tm, tn), jnp.float32)],
        compiler_params=pltpu.CompilerParams(
            dimension_semantics=("parallel", "parallel", "arbitrary"),
            vmem_limit_bytes=VMEM_LIMIT),
    )(xt, wt, b2)

    return out[:m].reshape(n, ho, wo, cout)


def maxpool_3x3_s2(x):
    """MaxPool2d(kernel=3, stride=2, padding=1) as a tiled tap reduction."""
    n, h, w, c = x.shape
    xp = jnp.pad(x, ((0, 0), (1, 1), (1, 1), (0, 0)), constant_values=-jnp.inf)
    _, hp, wp, _ = xp.shape
    ho = (hp - 3) // 2 + 1
    wo = (wp - 3) // 2 + 1
    m = n * ho * wo

    taps = [xp[:, i:i + 2 * ho:2, j:j + 2 * wo:2, :].reshape(m, c)
            for i in range(3) for j in range(3)]
    xt = jnp.stack(taps, axis=0)                            # (9, M, C)

    ntiles = _cdiv(m, TM_MAX)
    tm = _round_up(_cdiv(m, ntiles), 8)
    mpad = tm * ntiles
    if mpad != m:
        xt = jnp.pad(xt, ((0, 0), (0, mpad - m), (0, 0)))

    grid = (mpad // tm, 9)
    out = pl.pallas_call(
        _maxpool_kernel,
        out_shape=jax.ShapeDtypeStruct((mpad, c), x.dtype),
        grid=grid,
        in_specs=[pl.BlockSpec((1, tm, c), lambda i, t: (t, i, 0))],
        out_specs=pl.BlockSpec((tm, c), lambda i, t: (i, 0)),
        compiler_params=pltpu.CompilerParams(
            dimension_semantics=("parallel", "arbitrary"),
            vmem_limit_bytes=VMEM_LIMIT),
    )(xt)
    return out[:m].reshape(n, ho, wo, c)


def adaptive_avgpool_1x1(x):
    """AdaptiveAvgPool2d((1,1)) -> (N, C), gridded over (batch, channel tiles)."""
    n, h, w, c = x.shape
    xr = x.reshape(n, h * w, c)
    tc = 128 if c % 128 == 0 else c
    grid = (n, c // tc)
    return pl.pallas_call(
        _avgpool_kernel,
        out_shape=jax.ShapeDtypeStruct((n, c), jnp.float32),
        grid=grid,
        in_specs=[pl.BlockSpec((1, h * w, tc), lambda b, j: (b, 0, j))],
        out_specs=pl.BlockSpec((1, tc), lambda b, j: (b, j)),
        compiler_params=pltpu.CompilerParams(
            dimension_semantics=("parallel", "parallel"),
            vmem_limit_bytes=VMEM_LIMIT),
    )(xr)


# ----------------------------------------------------------------------------
# Deterministic synthetic ResNet18 parameters (frozen, inference-mode BN)
# ----------------------------------------------------------------------------
def _fold_bn(gamma, beta, mean, var):
    scale = gamma / jnp.sqrt(var + BN_EPS)
    bias = beta - mean * scale
    return scale, bias


def _init_conv(key, cout, cin, kh, kw):
    fan_in = cin * kh * kw
    return jax.random.normal(key, (cout, cin, kh, kw), jnp.float32) / math.sqrt(fan_in)


def _init_bn(key, c):
    k1, k2, k3, k4 = jax.random.split(key, 4)
    gamma = 1.0 + 0.1 * jax.random.normal(k1, (c,), jnp.float32)
    beta = 0.1 * jax.random.normal(k2, (c,), jnp.float32)
    mean = 0.1 * jax.random.normal(k3, (c,), jnp.float32)
    var = 1.0 + 0.1 * jnp.abs(jax.random.normal(k4, (c,), jnp.float32))
    return _fold_bn(gamma, beta, mean, var)


def init_resnet18_params(key):
    keys = iter(jax.random.split(key, 64))
    params = {'conv1_w': _init_conv(next(keys), 64, 3, 7, 7),
              'bn1': _init_bn(next(keys), 64)}
    stage_cfg = [('layer1', 64, 64, 1), ('layer2', 64, 128, 2),
                 ('layer3', 128, 256, 2), ('layer4', 256, 512, 2)]
    for name, cin, cout, stride in stage_cfg:
        blocks = []
        for b in range(2):
            bin_, s = (cin, stride) if b == 0 else (cout, 1)
            blk = {
                'w1': _init_conv(next(keys), cout, bin_, 3, 3),
                'bn1': _init_bn(next(keys), cout),
                'w2': _init_conv(next(keys), cout, cout, 3, 3),
                'bn2': _init_bn(next(keys), cout),
                'stride': s,
            }
            if s != 1 or bin_ != cout:
                blk['down_w'] = _init_conv(next(keys), cout, bin_, 1, 1)
                blk['down_bn'] = _init_bn(next(keys), cout)
            blocks.append(blk)
        params[name] = blocks
    return params


# ----------------------------------------------------------------------------
# Forward pass (mirrors ResNetFeatureExtractor.forward)
# ----------------------------------------------------------------------------
def basic_block(x, blk):
    s = blk['stride']
    sc1, bi1 = blk['bn1']
    sc2, bi2 = blk['bn2']
    if 'down_w' in blk:
        ds, db = blk['down_bn']
        identity = conv_strided(x, blk['down_w'], ds, db,
                                stride=s, padding=0, relu=False)
    else:
        identity = x
    if s == 1:
        h = conv3x3_s1(x, blk['w1'], sc1, bi1, relu=True)
    else:
        h = conv_strided(x, blk['w1'], sc1, bi1, stride=s, padding=1, relu=True)
    # out = relu(bn2(conv2(h)) + identity)   (fused in the Pallas epilogue)
    return conv3x3_s1(h, blk['w2'], sc2, bi2, relu=True, residual=identity)


def resnet_feature_extractor(x_nchw, params, layer_names=RESNETLAYERS):
    if x_nchw.shape[1] == 1:
        x_nchw = jnp.tile(x_nchw, (1, 3, 1, 1))             # inp.repeat(1,3,1,1)
    x = jnp.transpose(x_nchw, (0, 2, 3, 1)).astype(jnp.bfloat16)  # NCHW -> NHWC, bf16

    out = {}
    # layer0 = conv1 + bn1 + relu + maxpool
    s0, b0 = params['bn1']
    x = conv_strided(x, params['conv1_w'], s0, b0, stride=2, padding=3, relu=True)
    x = maxpool_3x3_s2(x)
    if 'layer0' in layer_names:
        out['layer0'] = jnp.transpose(x, (0, 3, 1, 2)).astype(jnp.float32)
    if layer_names[-1] == 'layer0':
        return out

    for name in ['layer1', 'layer2', 'layer3', 'layer4']:
        for blk in params[name]:
            x = basic_block(x, blk)
        if name in layer_names:
            out[name] = jnp.transpose(x, (0, 3, 1, 2)).astype(jnp.float32)
        if layer_names[-1] == name:
            return out

    pooled = adaptive_avgpool_1x1(x)                        # (N, 512) f32
    if 'avgpool' in layer_names:
        out['avgpool'] = pooled.reshape(pooled.shape[0], pooled.shape[1], 1, 1)
    return out


# ----------------------------------------------------------------------------
if __name__ == "__main__":
    key = jax.random.PRNGKey(0)
    pkey, xkey = jax.random.split(key)
    params = init_resnet18_params(pkey)

    # Single-channel input exercises the repeat-to-3-channels path.
    x = jax.random.normal(xkey, (2, 1, 16, 16), jnp.float32)

    feats = resnet_feature_extractor(x, params)
    jax.block_until_ready(feats)

    expected = {
        'layer0': (2, 64, 4, 4),
        'layer1': (2, 64, 4, 4),
        'layer2': (2, 128, 2, 2),
        'layer3': (2, 256, 1, 1),
        'layer4': (2, 512, 1, 1),
        'avgpool': (2, 512, 1, 1),
    }
    for name, shp in expected.items():
        assert feats[name].shape == shp, (name, feats[name].shape, shp)
        assert bool(jnp.all(jnp.isfinite(feats[name])))

    print("KERNEL_OK")
</pallas_src>

<mosaic_0001>
module attributes {stable_mosaic.version = 11 : i64} {
  func.func @_conv_strided_kernel(%arg0: i32, %arg1: i32, %arg2: i32, %arg3: memref<1x128x21xbf16, #tpu.memory_space<vmem>>, %arg4: memref<1x21x64xbf16, #tpu.memory_space<vmem>>, %arg5: memref<1x64xf32, #tpu.memory_space<vmem>>, %arg6: memref<128x64xbf16, #tpu.memory_space<vmem>>, %arg7: memref<128x64xf32, #tpu.memory_space<vmem>>) attributes {dimension_semantics = [#tpu.dimension_semantics<parallel>, #tpu.dimension_semantics<parallel>, #tpu.dimension_semantics<arbitrary>], iteration_bounds = array<i64: 1, 1, 7>, scalar_prefetch = 0 : i64, scratch_operands = 1 : i64, tpu.core_type = #tpu.core_type<tc>, window_params = [{transform_indices = @transform_0, window_bounds = array<i64: 1, 128, 21>}, {transform_indices = @transform_1, window_bounds = array<i64: 1, 21, 64>}, {transform_indices = @transform_2, window_bounds = array<i64: 1, 64>}, {transform_indices = @transform_3, window_bounds = array<i64: 128, 64>}]} {
    %c0_i32 = arith.constant 0 : i32
    %0 = arith.cmpi eq, %arg2, %c0_i32 : i32
    %1 = arith.extui %0 : i1 to i32
    %c0_i32_0 = arith.constant 0 : i32
    %2 = arith.cmpi ne, %1, %c0_i32_0 : i32
    scf.if %2 {
      %cst_11 = arith.constant 0.000000e+00 : f32
      %14 = vector.broadcast %cst_11 : f32 to vector<128x64xf32>
      %c0_12 = arith.constant 0 : index
      %c0_13 = arith.constant 0 : index
      %15 = vector.load %arg7[%c0_12, %c0_13] : memref<128x64xf32, #tpu.memory_space<vmem>>, vector<128x64xf32>
      tpu.vector_store %arg7[%c0_12, %c0_13], %14 {strides = array<i32>} : memref<128x64xf32, #tpu.memory_space<vmem>>, vector<128x64xf32>,
    } else {
    }
    %c0 = arith.constant 0 : index
    %c0_1 = arith.constant 0 : index
    %3 = vector.load %arg7[%c0, %c0_1] : memref<128x64xf32, #tpu.memory_space<vmem>>, vector<128x64xf32>
    %c0_2 = arith.constant 0 : index
    %c0_3 = arith.constant 0 : index
    %c0_4 = arith.constant 0 : index
    %4 = vector.load %arg3[%c0_2, %c0_3, %c0_4] : memref<1x128x21xbf16, #tpu.memory_space<vmem>>, vector<1x128x21xbf16>
    %5 = vector.shape_cast %4 : vector<1x128x21xbf16> to vector<128x21xbf16>
    %c0_5 = arith.constant 0 : index
    %c0_6 = arith.constant 0 : index
    %c0_7 = arith.constant 0 : index
    %6 = vector.load %arg4[%c0_5, %c0_6, %c0_7] : memref<1x21x64xbf16, #tpu.memory_space<vmem>>, vector<1x21x64xbf16>
    %7 = vector.shape_cast %6 : vector<1x21x64xbf16> to vector<21x64xbf16>
    %cst = arith.constant dense<0.000000e+00> : vector<128x64xf32>
    %8 = tpu.matmul %5, %7, %cst {dimension_numbers = #tpu.dot_dimension_numbers<[1], [0], [0], [1], [0, 0, 1, 1], [], []>} : vector<128x21xbf16>, vector<21x64xbf16>, vector<128x64xf32> -> vector<128x64xf32>
    %9 = arith.addf %3, %8 : vector<128x64xf32>
    %c0_8 = arith.constant 0 : index
    %c0_9 = arith.constant 0 : index
    %10 = vector.load %arg7[%c0_8, %c0_9] : memref<128x64xf32, #tpu.memory_space<vmem>>, vector<128x64xf32>
    tpu.vector_store %arg7[%c0_8, %c0_9], %9 {strides = array<i32>} : memref<128x64xf32, #tpu.memory_space<vmem>>, vector<128x64xf32>,
    %c6_i32 = arith.constant 6 : i32
    %11 = arith.cmpi eq, %arg2, %c6_i32 : i32
    %12 = arith.extui %11 : i1 to i32
    %c0_i32_10 = arith.constant 0 : i32
    %13 = arith.cmpi ne, %12, %c0_i32_10 : i32
    scf.if %13 {
      %c0_11 = arith.constant 0 : index
      %c0_12 = arith.constant 0 : index
      %14 = vector.load %arg7[%c0_11, %c0_12] : memref<128x64xf32, #tpu.memory_space<vmem>>, vector<128x64xf32>
      %c0_13 = arith.constant 0 : index
      %c0_14 = arith.constant 0 : index
      %15 = vector.load %arg5[%c0_13, %c0_14] : memref<1x64xf32, #tpu.memory_space<vmem>>, vector<1x64xf32>
      %16 = vector.broadcast %15 : vector<1x64xf32> to vector<128x64xf32>
      %17 = arith.addf %14, %16 : vector<128x64xf32>
      %cst_15 = arith.constant 0.000000e+00 : f32
      %18 = vector.broadcast %cst_15 : f32 to vector<128x64xf32>
      %19 = arith.maximumf %17, %18 : vector<128x64xf32>
      %20 = arith.truncf %19 : vector<128x64xf32> to vector<128x64xbf16>
      %c0_16 = arith.constant 0 : index
      %c0_17 = arith.constant 0 : index
      %21 = vector.load %arg6[%c0_16, %c0_17] : memref<128x64xbf16, #tpu.memory_space<vmem>>, vector<128x64xbf16>
      tpu.vector_store %arg6[%c0_16, %c0_17], %20 {strides = array<i32>} : memref<128x64xbf16, #tpu.memory_space<vmem>>, vector<128x64xbf16>,
    } else {
    }
    return
  }
  func.func @transform_0(%arg0: i32, %arg1: i32, %arg2: i32) -> (i32, i32, i32) {
    %c0_i32 = arith.constant 0 : i32
    %c0_i32_0 = arith.constant 0 : i32
    return %arg2, %arg0, %c0_i32 : i32, i32, i32
  }
  func.func @transform_1(%arg0: i32, %arg1: i32, %arg2: i32) -> (i32, i32, i32) {
    %c0_i32 = arith.constant 0 : i32
    %c0_i32_0 = arith.constant 0 : i32
    return %arg2, %c0_i32, %arg1 : i32, i32, i32
  }
  func.func @transform_2(%arg0: i32, %arg1: i32, %arg2: i32) -> (i32, i32) {
    %c0_i32 = arith.constant 0 : i32
    %c0_i32_0 = arith.constant 0 : i32
    return %c0_i32, %arg1 : i32, i32
  }
  func.func @transform_3(%arg0: i32, %arg1: i32, %arg2: i32) -> (i32, i32) {
    %c0_i32 = arith.constant 0 : i32
    return %arg0, %arg1 : i32, i32
  }
}

</mosaic_0001>

<bundles_post_ra>
// kernel: tpu_custom_call.1
= control target key start
LH: loop header
LB: loop body
LE: loop exit
PB: predicated region body
PF: predicated region fallthrough
CT: control target
= control target key end

     0   :  { %s962_s12 = smov 0   ;;  %s964_s13 = smov 0   ;;  %s1118_s0 = inlined_call_operand.vmem [shape: bf16[7,128,21], index: 0, kind: input, shape index: {}]   ;;  %s1119_s1 = inlined_call_operand.vmem [shape: bf16[7,21,64], index: 1, kind: input, shape index: {}]   ;;  %s1120_s2 = inlined_call_operand.vmem [shape: f32[1,64], index: 2, kind: input, shape index: {}]   ;;  %s1121_s3 = inlined_call_operand.vmem [shape: bf16[128,64], index: 3, kind: output, shape index: {}]  }
   0x1   :  { %s966_s14 = smov 0  }
   0x2 LB: > { %s25_s15 = sadd.s32 1, %s934_s13  ;;  %p783_p0 = scmp.ge.s32.totalorder %s938_s14, 1  ;;  %s938_s14 = sphi %s966_s14, %s13_s14   ;;  %s934_s13 = sphi %s964_s13, %s1123_s13   ;;  %s930_s12 = sphi %s962_s12, %s1122_s12  }
   0x3   : > { %p26_p1 = scmp.ge.s32.totalorder %s25_s15, 7  ;;  %p188_p2 = scmp.lt.s32.totalorder %s938_s14, 8 }
   0x5   : > { %s1125_s15 = smov (%p26_p1, %s25_s15), 0  ;;  %p189_p3 = pnand %p783_p0, %p188_p2 }
   0x6   : > { %p231_p4 = scmp.lt.s32.totalorder (!%p189_p3), %s930_s12, 6  ;;  %p787_p5 = scmp.ne.s32.totalorder (!%p189_p3), %s930_s12, 0 }
   0x7   : > { %192 = sbr.rel (%p189_p3) target bundleno = 267 (0x10b), region = 32 }
   0xc   : > { %s232_s16 = scalar_select %p231_p4, %s930_s12, 6 }
   0xd   : > { %264 = sbr.rel (%p787_p5) target bundleno = 27 (0x1b), region = 36 }
   0xe   : > { %s828_s17 = sshll.u32 %s232_s16, 6  ;;  %s879_s18 = smul.u32 12, %s232_s16 }
   0xf   : > { %s987_s21 = scalar_lea.vmem %s1118_s0, %s828_s17 }
  0x10   : > { %s247_s24 = scalar_lea.vmem %s1119_s1, %s879_s18 }
  0x12   : > { %vm265_vm0 = vcmask 523264   ;;  %v940_v0 = vmov 0.0  }
  0x13   : > { %266 = vst.msk [vmem:[#allocation2] sm:$0xff] %vm265_vm0, %v940_v0  ;;  %267 = vst.msk [vmem:[#allocation2 + $0x8] sm:$0xff] %vm265_vm0, %v940_v0 }
  0x14   : > { %268 = vst.msk [vmem:[#allocation2 + $0x10] sm:$0xff] %vm265_vm0, %v940_v0  ;;  %269 = vst.msk [vmem:[#allocation2 + $0x18] sm:$0xff] %vm265_vm0, %v940_v0 }
  0x15   : > { %270 = vst.msk [vmem:[#allocation2 + $0x20] sm:$0xff] %vm265_vm0, %v940_v0  ;;  %271 = vst.msk [vmem:[#allocation2 + $0x28] sm:$0xff] %vm265_vm0, %v940_v0 }
  0x16   : > { %272 = vst.msk [vmem:[#allocation2 + $0x30] sm:$0xff] %vm265_vm0, %v940_v0  ;;  %273 = vst.msk [vmem:[#allocation2 + $0x38] sm:$0xff] %vm265_vm0, %v940_v0 }
  0x17   : > { %274 = vst.msk [vmem:[#allocation2 + $0x40] sm:$0xff] %vm265_vm0, %v940_v0  ;;  %275 = vst.msk [vmem:[#allocation2 + $0x48] sm:$0xff] %vm265_vm0, %v940_v0 }
  0x18   : > { %276 = vst.msk [vmem:[#allocation2 + $0x50] sm:$0xff] %vm265_vm0, %v940_v0  ;;  %277 = vst.msk [vmem:[#allocation2 + $0x58] sm:$0xff] %vm265_vm0, %v940_v0 }
  0x19   : > { %278 = vst.msk [vmem:[#allocation2 + $0x60] sm:$0xff] %vm265_vm0, %v940_v0  ;;  %279 = vst.msk [vmem:[#allocation2 + $0x68] sm:$0xff] %vm265_vm0, %v940_v0 }
  0x1a   : > { %280 = vst.msk [vmem:[#allocation2 + $0x70] sm:$0xff] %vm265_vm0, %v940_v0  ;;  %281 = vst.msk [vmem:[#allocation2 + $0x78] sm:$0xff] %vm265_vm0, %v940_v0 }
  0x1b PF: > { %v906_v1 = vld [vmem:[%s247_s24 + $0x8] ss:$0 sps:$4 sm:$0x77]   ;;  %vm391_vm1 = vcmask 1041408   ;;  %vm392_vm2 = vcmask 1042432   ;;  %v941_v2 = vmov 65535  }
  0x1c   : > { %v393_v3 = vsel %vm391_vm1, 4294967295, %v941_v2  ;;  %v907_v4 = vld [vmem:[%s247_s24] sm:$0xff]   ;;  %vm366_vm3 = vcmask 171008   ;;  %v910_v9 = vld [vmem:[%s987_s21 + $0x8] sm:$0xff]   ;;  %v912_v11 = vld [vmem:[%s987_s21 + $0x10] sm:$0xff]   ;;  %vm511_vm4 = vcmask 523264  }
  0x1d   : > { %v394_v5 = vsel %vm392_vm2, %v393_v3, 0  ;;  %v908_v6 = vld [vmem:[%s987_s21] sm:$0xff]   ;;  %v911_v10 = vld [vmem:[%s987_s21 + $0x28] sm:$0xff]   ;;  %v913_v12 = vld [vmem:[%s987_s21 + $0x30] sm:$0xff]   ;;  %p806_p6 = scmp.ne.s32.totalorder %s930_s12, 6 }
  0x1e   : > { %v909_v7 = vld [vmem:[%s987_s21 + $0x20] sm:$0xff]   ;;  %v396_v8 = vand.u32 %v906_v1, %v394_v5  ;;  %859 = vmatprep.mubr.msk.bf16.mxu0 %vm366_vm3, %v908_v6  ;;  %v914_v13 = vld [vmem:[%s987_s21 + $0x18] sm:$0xff]   ;;  %v284_v15 = vld [vmem:[#allocation2 + $0x10] sm:$0xff] }
  0x1f   : > { %867 = vmatprep.mubr.msk.bf16.mxu1 %vm366_vm3, %v909_v7  ;;  %v915_v14 = vld [vmem:[%s987_s21 + $0x38] sm:$0xff]   ;;  %v292_v16 = vld [vmem:[#allocation2 + $0x50] sm:$0xff]  ;;  %v282_v19 = vld [vmem:[#allocation2] sm:$0xff] }
  0x20   : > { %855 = vmatprep.subr.bf16.mxu0 %v396_v8  ;;  %875 = vmatprep.subr.bf16.mxu1 %v396_v8  ;;  %v290_v20 = vld [vmem:[#allocation2 + $0x40] sm:$0xff]  ;;  %v285_v25 = vld [vmem:[#allocation2 + $0x18] sm:$0xff]  ;;  %v283_v31 = vld [vmem:[#allocation2 + $0x8] sm:$0xff] }
  0x21   : > { %856 = vmatpush3.bf16.msra.mxu0 %v396_v8  ;;  %877 = vmatpush3.bf16.msra.mxu1 %v396_v8  ;;  %v293_v26 = vld [vmem:[#allocation2 + $0x58] sm:$0xff]  ;;  %v291_v32 = vld [vmem:[#allocation2 + $0x48] sm:$0xff]  ;;  %v288_v37 = vld [vmem:[#allocation2 + $0x30] sm:$0xff] }
  0x22   : > { %857 = vmatprep.subr.bf16.mxu0 %v907_v4  ;;  %876 = vmatprep.subr.bf16.mxu1 %v907_v4  ;;  %v296_v38 = vld [vmem:[#allocation2 + $0x70] sm:$0xff]  ;;  %v286_v43 = vld [vmem:[#allocation2 + $0x20] sm:$0xff]  ;;  %v289_v49 = vld [vmem:[#allocation2 + $0x38] sm:$0xff] }
  0x23   : > { %v294_v44 = vld [vmem:[#allocation2 + $0x60] sm:$0xff]  ;;  %v297_v50 = vld [vmem:[#allocation2 + $0x78] sm:$0xff]  ;;  %v287_v55 = vld [vmem:[#allocation2 + $0x28] sm:$0xff] }
  0x24   : > { %v295_v56 = vld [vmem:[#allocation2 + $0x68] sm:$0xff] }
  0x25   : > { %858 = vmatpush3.bf16.msra.mxu0 %v907_v4  ;;  %878 = vmatpush3.bf16.msra.mxu1 %v907_v4 }
  0x28   : > { %860 = vmatmul.mubr.msk.bf16.vlgmr.msra.gmra.mxu0 %vm366_vm3, %v910_v9  ;;  %868 = vmatmul.mubr.msk.bf16.vlgmr.msra.gmra.mxu1 %vm366_vm3, %v911_v10 }
  0x29   : > { %863 = vmatprep.mubr.msk.bf16.mxu0 %vm366_vm3, %v912_v11  ;;  %871 = vmatprep.mubr.msk.bf16.mxu1 %vm366_vm3, %v913_v12 }
  0x30   : > { %864 = vmatmul.mubr.msk.bf16.gmra.mxu0 %vm366_vm3, %v914_v13  ;;  %872 = vmatmul.mubr.msk.bf16.gmra.mxu1 %vm366_vm3, %v915_v14 }
  0xe8   : > { %v861_v17 = vpop.f32.mrf.mxu0  ;;  %v869_v18 = vpop.f32.mrf.mxu1 }
  0xe9   : > { %v497_v21 = vadd.f32 %v861_v17, %v284_v15  ;;  %v505_v22 = vadd.f32 %v869_v18, %v292_v16 }
  0xea   : > { %v432_v23 = vpop.f32.mrf.mxu0  ;;  %v464_v24 = vpop.f32.mrf.mxu1 }
  0xeb   : > { %514 = vst.msk [vmem:[#allocation2 + $0x10] sm:$0xff] %vm511_vm4, %v497_v21  ;;  %522 = vst.msk [vmem:[#allocation2 + $0x50] sm:$0xff] %vm511_vm4, %v505_v22  ;;  %v495_v27 = vadd.f32 %v432_v23, %v282_v19  ;;  %v503_v28 = vadd.f32 %v464_v24, %v290_v20 }
  0xec   : > { %v862_v29 = vpop.f32.mrf.mxu0  ;;  %v870_v30 = vpop.f32.mrf.mxu1 }
  0xed   : > { %512 = vst.msk [vmem:[#allocation2] sm:$0xff] %vm511_vm4, %v495_v27  ;;  %520 = vst.msk [vmem:[#allocation2 + $0x40] sm:$0xff] %vm511_vm4, %v503_v28  ;;  %v498_v33 = vadd.f32 %v862_v29, %v285_v25  ;;  %v506_v34 = vadd.f32 %v870_v30, %v293_v26 }
  0xee   : > { %v435_v35 = vpop.f32.mrf.mxu0  ;;  %v467_v36 = vpop.f32.mrf.mxu1 }
  0xef   : > { %515 = vst.msk [vmem:[#allocation2 + $0x18] sm:$0xff] %vm511_vm4, %v498_v33  ;;  %523 = vst.msk [vmem:[#allocation2 + $0x58] sm:$0xff] %vm511_vm4, %v506_v34  ;;  %v496_v39 = vadd.f32 %v435_v35, %v283_v31  ;;  %v504_v40 = vadd.f32 %v467_v36, %v291_v32 }
  0xf0   : > { %v865_v41 = vpop.f32.mrf.mxu0  ;;  %v873_v42 = vpop.f32.mrf.mxu1 }
  0xf1   : > { %513 = vst.msk [vmem:[#allocation2 + $0x8] sm:$0xff] %vm511_vm4, %v496_v39  ;;  %521 = vst.msk [vmem:[#allocation2 + $0x48] sm:$0xff] %vm511_vm4, %v504_v40  ;;  %v501_v45 = vadd.f32 %v865_v41, %v288_v37  ;;  %v509_v46 = vadd.f32 %v873_v42, %v296_v38 }
  0xf2   : > { %v448_v47 = vpop.f32.mrf.mxu0  ;;  %v480_v48 = vpop.f32.mrf.mxu1 }
  0xf3   : > { %518 = vst.msk [vmem:[#allocation2 + $0x30] sm:$0xff] %vm511_vm4, %v501_v45  ;;  %526 = vst.msk [vmem:[#allocation2 + $0x70] sm:$0xff] %vm511_vm4, %v509_v46  ;;  %v499_v51 = vadd.f32 %v448_v47, %v286_v43  ;;  %v507_v52 = vadd.f32 %v480_v48, %v294_v44 }
  0xf4   : > { %v866_v53 = vpop.f32.mrf.mxu0  ;;  %v874_v54 = vpop.f32.mrf.mxu1 }
  0xf5   : > { %516 = vst.msk [vmem:[#allocation2 + $0x20] sm:$0xff] %vm511_vm4, %v499_v51  ;;  %524 = vst.msk [vmem:[#allocation2 + $0x60] sm:$0xff] %vm511_vm4, %v507_v52  ;;  %v502_v57 = vadd.f32 %v866_v53, %v289_v49  ;;  %v510_v58 = vadd.f32 %v874_v54, %v297_v50  ;;  %531 = sbr.rel (%p806_p6) target bundleno = 267 (0x10b), region = 40 }
  0xf6   : > { %v451_v59 = vpop.f32.mrf.mxu0  ;;  %v483_v60 = vpop.f32.mrf.mxu1 }
  0xf7   : > { %519 = vst.msk [vmem:[#allocation2 + $0x38] sm:$0xff] %vm511_vm4, %v502_v57  ;;  %527 = vst.msk [vmem:[#allocation2 + $0x78] sm:$0xff] %vm511_vm4, %v510_v58  ;;  %v500_v61 = vadd.f32 %v451_v59, %v287_v55  ;;  %v508_v62 = vadd.f32 %v483_v60, %v295_v56 }
  0xf9   : > { %517 = vst.msk [vmem:[#allocation2 + $0x28] sm:$0xff] %vm511_vm4, %v500_v61  ;;  %525 = vst.msk [vmem:[#allocation2 + $0x68] sm:$0xff] %vm511_vm4, %v508_v62 }
  0xfa   : > { %v532_v63 = vld [vmem:[#allocation2] sm:$0xff]  ;;  %v533_v1 = vld [vmem:[#allocation2 + $0x8] sm:$0xff]  ;;  %v534_v4 = vld [vmem:[#allocation2 + $0x10] sm:$0xff]  ;;  %vm651_vm5 = vcmask 519168  }
  0xfb   : > { %v807_v0 = vld [vmem:[%s1120_s2] ss:$0 sm:$0xff]  ;;  %v535_v5 = vld [vmem:[#allocation2 + $0x18] sm:$0xff]  ;;  %v538_v11 = vld [vmem:[#allocation2 + $0x30] sm:$0xff] }
  0xfc   : > { %v555_v2 = vadd.f32 %v807_v0, %v532_v63  ;;  %v556_v3 = vadd.f32 %v807_v0, %v533_v1  ;;  %v536_v6 = vld [vmem:[#allocation2 + $0x20] sm:$0xff]  ;;  %v557_v7 = vadd.f32 %v807_v0, %v534_v4  ;;  %v558_v8 = vadd.f32 %v807_v0, %v535_v5  ;;  %v541_v22 = vld [vmem:[#allocation2 + $0x48] sm:$0xff]  ;;  %v542_v27 = vld [vmem:[#allocation2 + $0x50] sm:$0xff] }
  0xfd   : > { %v559_v9 = vadd.f32 %v807_v0, %v536_v6  ;;  %v561_v16 = vadd.f32 %v807_v0, %v538_v11  ;;  %v540_v21 = vld [vmem:[#allocation2 + $0x40] sm:$0xff]  ;;  %v543_v28 = vld [vmem:[#allocation2 + $0x58] sm:$0xff]  ;;  %v546_v35 = vld [vmem:[#allocation2 + $0x70] sm:$0xff]  ;;  %v564_v39 = vadd.f32 %v807_v0, %v541_v22  ;;  %v565_v42 = vadd.f32 %v807_v0, %v542_v27 }
  0xfe   : > { %v539_v12 = vld [vmem:[#allocation2 + $0x38] sm:$0xff]  ;;  %v571_v13 = vmax.f32 %v555_v2, 0.0  ;;  %v572_v14 = vmax.f32 %v556_v3, 0.0  ;;  %v573_v17 = vmax.f32 %v557_v7, 0.0  ;;  %v574_v18 = vmax.f32 %v558_v8, 0.0  ;;  %v544_v29 = vld [vmem:[#allocation2 + $0x60] sm:$0xff] }
  0xff   : > { %v575_v19 = vmax.f32 %v559_v9, 0.0  ;;  %v562_v20 = vadd.f32 %v807_v0, %v539_v12  ;;  %v577_v26 = vmax.f32 %v561_v16, 0.0  ;;  %v563_v38 = vadd.f32 %v807_v0, %v540_v21  ;;  %v547_v40 = vld [vmem:[#allocation2 + $0x78] sm:$0xff] }
 0x100   : > { %v537_v10 = vld [vmem:[#allocation2 + $0x28] sm:$0xff]  ;;  %v829_v23 = vpack.c.bf16 %v571_v13, %v571_v13  ;;  %v830_v24 = vpack.c.bf16 %v572_v14, %v572_v14  ;;  %v831_v30 = vpack.c.bf16 %v573_v17, %v573_v17  ;;  %v832_v31 = vpack.c.bf16 %v574_v18, %v574_v18 }
 0x101   : > { %v560_v15 = vadd.f32 %v807_v0, %v537_v10  ;;  %v833_v32 = vpack.c.bf16 %v575_v19, %v575_v19  ;;  %v578_v33 = vmax.f32 %v562_v20, 0.0  ;;  %v545_v34 = vld [vmem:[#allocation2 + $0x68] sm:$0xff]  ;;  %v835_v37 = vpack.c.bf16 %v577_v26, %v577_v26 }
 0x102   : > { %652 = vst.msk [vmem:[%s1121_s3] sm:$0xf] %vm651_vm5, %v829_v23  ;;  %653 = vst.msk [vmem:[%s1121_s3 + $0x4] sm:$0xf] %vm651_vm5, %v830_v24  ;;  %v566_v43 = vadd.f32 %v807_v0, %v543_v28  ;;  %v567_v44 = vadd.f32 %v807_v0, %v544_v29  ;;  %v579_v45 = vmax.f32 %v563_v38, 0.0  ;;  %v580_v46 = vmax.f32 %v564_v39, 0.0 }
 0x103   : > { %v576_v25 = vmax.f32 %v560_v15, 0.0  ;;  %654 = vst.msk [vmem:[%s1121_s3 + $0x8] sm:$0xf] %vm651_vm5, %v831_v30  ;;  %655 = vst.msk [vmem:[%s1121_s3 + $0xc] sm:$0xf] %vm651_vm5, %v832_v31  ;;  %v836_v41 = vpack.c.bf16 %v578_v33, %v578_v33  ;;  %v568_v47 = vadd.f32 %v807_v0, %v545_v34  ;;  %v569_v48 = vadd.f32 %v807_v0, %v546_v35 }
 0x104   : > { %656 = vst.msk [vmem:[%s1121_s3 + $0x10] sm:$0xf] %vm651_vm5, %v833_v32  ;;  %658 = vst.msk [vmem:[%s1121_s3 + $0x18] sm:$0xf] %vm651_vm5, %v835_v37  ;;  %v581_v49 = vmax.f32 %v565_v42, 0.0  ;;  %v582_v50 = vmax.f32 %v566_v43, 0.0  ;;  %v570_v52 = vadd.f32 %v807_v0, %v547_v40  ;;  %v837_v53 = vpack.c.bf16 %v579_v45, %v579_v45 }
 0x105   : > { %v834_v36 = vpack.c.bf16 %v576_v25, %v576_v25  ;;  %659 = vst.msk [vmem:[%s1121_s3 + $0x1c] sm:$0xf] %vm651_vm5, %v836_v41  ;;  %v583_v51 = vmax.f32 %v567_v44, 0.0  ;;  %v838_v54 = vpack.c.bf16 %v580_v46, %v580_v46  ;;  %v584_v55 = vmax.f32 %v568_v47, 0.0 }
 0x106   : > { %v585_v56 = vmax.f32 %v569_v48, 0.0  ;;  %v839_v57 = vpack.c.bf16 %v581_v49, %v581_v49  ;;  %v840_v58 = vpack.c.bf16 %v582_v50, %v582_v50  ;;  %v586_v60 = vmax.f32 %v570_v52, 0.0  ;;  %660 = vst.msk [vmem:[%s1121_s3 + $0x20] sm:$0xf] %vm651_vm5, %v837_v53 }
 0x107   : > { %657 = vst.msk [vmem:[%s1121_s3 + $0x14] sm:$0xf] %vm651_vm5, %v834_v36  ;;  %v841_v59 = vpack.c.bf16 %v583_v51, %v583_v51  ;;  %661 = vst.msk [vmem:[%s1121_s3 + $0x24] sm:$0xf] %vm651_vm5, %v838_v54  ;;  %v842_v61 = vpack.c.bf16 %v584_v55, %v584_v55 }
 0x108   : > { %v843_v62 = vpack.c.bf16 %v585_v56, %v585_v56  ;;  %662 = vst.msk [vmem:[%s1121_s3 + $0x28] sm:$0xf] %vm651_vm5, %v839_v57  ;;  %663 = vst.msk [vmem:[%s1121_s3 + $0x2c] sm:$0xf] %vm651_vm5, %v840_v58  ;;  %v844_v63 = vpack.c.bf16 %v586_v60, %v586_v60 }
 0x109   : > { %664 = vst.msk [vmem:[%s1121_s3 + $0x30] sm:$0xf] %vm651_vm5, %v841_v59  ;;  %665 = vst.msk [vmem:[%s1121_s3 + $0x34] sm:$0xf] %vm651_vm5, %v842_v61 }
 0x10a   : > { %666 = vst.msk [vmem:[%s1121_s3 + $0x38] sm:$0xf] %vm651_vm5, %v843_v62  ;;  %667 = vst.msk [vmem:[%s1121_s3 + $0x3c] sm:$0xf] %vm651_vm5, %v844_v63 }
 0x10b PF: > { %s13_s14 = sadd.s32 1, %s938_s14   ;;  %s1122_s12 = smov %s934_s13 }
 0x10c   : > { %p10_p7 = scmp.ge.s32.totalorder %s13_s14, 9   ;;  %s1123_s13 = smov %s1125_s15 }
 0x10e   :  { %12 = sbr.rel (!%p10_p7) target bundleno = 2 (0x2), region = 76 }

</bundles_post_ra>
